<compile_context>
chip_gen: v7x
topology: tpu7x:2x2x1
jax: 0.10.0
libtpu: 0.0.40
codegen_flags: <defaults>
</compile_context>

<pallas_src>
import functools

import jax
import jax.numpy as jnp
from jax.experimental import pallas as pl
from jax.experimental.pallas import tpu as pltpu

EPS = 1e-5
VMEM_CAP = 40 * 1024 * 1024     # v7x-safe ceiling (64 MiB / TensorCore physical)
VMEM_FLOOR = 16 * 1024 * 1024


def _round_up(x, m):
    return (x + m - 1) // m * m


# ----------------------------------------------------------------------------
# Pallas kernels
# ----------------------------------------------------------------------------
def _mm_kernel(a_ref, b_ref, s_ref, c_ref, o_ref, *, relu):
    """Single-K-step fused matmul: out = [relu]((A @ B) * scale + bias)."""
    acc = jnp.dot(a_ref[...], b_ref[...], preferred_element_type=jnp.float32)
    out = acc * s_ref[...] + c_ref[...]
    if relu:
        out = jnp.maximum(out, 0.0)
    o_ref[...] = out.astype(o_ref.dtype)


def _mm_res_kernel(a_ref, b_ref, s_ref, c_ref, r_ref, o_ref):
    """Fused matmul + folded BN + residual add + ReLU (bottleneck conv3 epilogue)."""
    acc = jnp.dot(a_ref[...], b_ref[...], preferred_element_type=jnp.float32)
    out = acc * s_ref[...] + c_ref[...] + r_ref[...].astype(jnp.float32)
    o_ref[...] = jnp.maximum(out, 0.0).astype(o_ref.dtype)


def _maxpool_kernel(x_ref, o_ref, *, Ho, Wo, C):
    """3x3/stride-2 max pool of one image.

    The input block is the spatially padded image reshaped to (Ho+1, 2, Wo+1, 2*C)
    (even/odd row & column pairing), so every one of the 9 taps is a contiguous,
    statically offset slice -- no strided or gather access.
    """
    m = None
    for hq, hs in ((0, 0), (0, 1), (1, 0)):        # input rows 2ho, 2ho+1, 2ho+2
        for wq, cs in ((0, 0), (0, 1), (1, 0)):    # input cols 2wo, 2wo+1, 2wo+2
            t = x_ref[0, hq:hq + Ho, hs, wq:wq + Wo, cs * C:(cs + 1) * C]
            m = t if m is None else jnp.maximum(m, t)
    o_ref[0] = m


# ----------------------------------------------------------------------------
# Fused matmul wrapper (single collapsed K step)
# ----------------------------------------------------------------------------
def _choose_tiles(M, Kp, Np):
    """K is never split (max K in ResNet50 = 4608 fits VMEM). Returns (tm, Mp, tn)."""
    if M <= 1024:
        tm, Mp = M, M                    # one M tile; block dim == full dim: no pad/slice
    else:
        tm = next((t for t in (1024, 512, 256, 128) if M % t == 0), 512)
        Mp = _round_up(M, tm)
    # N tile: biggest aligned tile, but keep >=2 tiles on a parallel axis when the
    # M axis has only one tile (v7x has 2 TensorCores).
    if Np % 512 == 0 and Np >= 1024:
        tn = 512
    elif Np % 256 == 0 and (Np >= 512 or Mp // tm >= 2):
        tn = 256
    else:
        tn = 128
    # VMEM guard: keep double-buffered blocks well under the 40 MiB per-call cap.
    def est(tm_):
        return 4 * (tm_ * Kp + Kp * tn) + 12 * tm_ * tn
    while est(tm) > 28 * 1024 * 1024 and tm > 128:
        tm = max(128, tm // 2)
        Mp = _round_up(M, tm)
    return tm, Mp, tn


def matmul_fused(a, w_p, scale_p, bias_p, *, relu, residual=None,
                 out_dtype=jnp.bfloat16):
    """out = [relu]((a @ w) * scale + bias [+ residual]) in one Pallas call.

    a:        (M, K) activations (cast to bf16)
    w_p:      (Kp, Np) bf16 weights, pre-padded to 128-multiples at prep time
    scale_p:  (1, Np) f32 folded-BN scale;  bias_p: (1, Np) f32 folded-BN bias
    residual: optional (M, Np) -> fused residual add + ReLU epilogue
    """
    M, K = a.shape
    Kp, Np = w_p.shape
    tm, Mp, tn = _choose_tiles(M, Kp, Np)

    a_p = a.astype(jnp.bfloat16)
    if (Mp, Kp) != (M, K):
        a_p = jnp.pad(a_p, ((0, Mp - M), (0, Kp - K)))

    in_specs = [
        pl.BlockSpec((tm, Kp), lambda i, j: (i, 0)),
        pl.BlockSpec((Kp, tn), lambda i, j: (0, j)),
        pl.BlockSpec((1, tn), lambda i, j: (0, j)),
        pl.BlockSpec((1, tn), lambda i, j: (0, j)),
    ]
    operands = [a_p, w_p, scale_p, bias_p]
    if residual is None:
        kernel = functools.partial(_mm_kernel, relu=relu)
    else:
        r_p = residual.astype(jnp.bfloat16)
        if r_p.shape != (Mp, Np):
            r_p = jnp.pad(r_p, ((0, Mp - r_p.shape[0]), (0, Np - r_p.shape[1])))
        in_specs.append(pl.BlockSpec((tm, tn), lambda i, j: (i, j)))
        operands.append(r_p)
        kernel = _mm_res_kernel

    est = 4 * (tm * Kp + Kp * tn) + 12 * tm * tn
    if residual is not None:
        est += 4 * tm * tn
    vmem_limit = int(min(VMEM_CAP, max(VMEM_FLOOR, 2 * est)))

    out = pl.pallas_call(
        kernel,
        out_shape=jax.ShapeDtypeStruct((Mp, Np), out_dtype),
        grid_spec=pltpu.PrefetchScalarGridSpec(
            num_scalar_prefetch=0,
            grid=(Mp // tm, Np // tn),
            in_specs=in_specs,
            out_specs=pl.BlockSpec((tm, tn), lambda i, j: (i, j)),
        ),
        compiler_params=pltpu.CompilerParams(
            dimension_semantics=("parallel", "parallel"),
            vmem_limit_bytes=vmem_limit),
    )(*operands)
    if Mp != M:
        out = out[:M]
    return out


# ----------------------------------------------------------------------------
# Max pool 3x3 / stride 2 / pad 1 (direct, one Pallas kernel, no tap stacking)
# ----------------------------------------------------------------------------
def maxpool_3x3_s2(x):
    """PyTorch MaxPool2d(kernel_size=3, stride=2, padding=1) on an NHWC tensor."""
    N, H, W, C = x.shape
    Ho = (H - 1) // 2 + 1
    Wo = (W - 1) // 2 + 1
    Hp, Wp = 2 * (Ho + 1), 2 * (Wo + 1)
    neg = float(jnp.finfo(x.dtype).min)
    xp = jnp.pad(x, ((0, 0), (1, Hp - H - 1), (1, Wp - W - 1), (0, 0)),
                 constant_values=neg)
    # contiguity-preserving (free) reshape: even/odd rows and columns become axes
    xr = xp.reshape(N, Ho + 1, 2, Wo + 1, 2 * C)

    blk_in = (Ho + 1) * 2 * (Wo + 1) * 2 * C * x.dtype.itemsize
    blk_out = Ho * Wo * C * x.dtype.itemsize
    vmem_limit = int(min(VMEM_CAP, max(VMEM_FLOOR, 4 * (blk_in + blk_out))))
    # TODO(synk): whole padded image is one block per grid step; tile over output rows
    # (manual halo DMA) if it ever outgrows VMEM for very large inputs.

    return pl.pallas_call(
        functools.partial(_maxpool_kernel, Ho=Ho, Wo=Wo, C=C),
        out_shape=jax.ShapeDtypeStruct((N, Ho, Wo, C), x.dtype),
        grid_spec=pltpu.PrefetchScalarGridSpec(
            num_scalar_prefetch=0,
            grid=(N,),
            in_specs=[pl.BlockSpec((1, Ho + 1, 2, Wo + 1, 2 * C),
                                   lambda n: (n, 0, 0, 0, 0))],
            out_specs=pl.BlockSpec((1, Ho, Wo, C), lambda n: (n, 0, 0, 0)),
        ),
        compiler_params=pltpu.CompilerParams(
            dimension_semantics=("parallel",),
            vmem_limit_bytes=vmem_limit),
    )(xr)


# ----------------------------------------------------------------------------
# Conv (+ folded BN, + ReLU, + fused residual) on top of the fused matmul
# ----------------------------------------------------------------------------
def conv_bn(x, prep, *, relu, residual=None):
    """x: NHWC bf16 activation whose channel count equals the producer's padded cout.
    Returns NHWC bf16 with prep['cout_pad'] channels (padded channels are exactly 0)."""
    N, H, W, C = x.shape
    kh, kw, stride, pad = prep['kh'], prep['kw'], prep['stride'], prep['pad']
    Ho = (H + 2 * pad - kh) // stride + 1
    Wo = (W + 2 * pad - kw) // stride + 1
    if kh == 1 and kw == 1 and pad == 0:
        patches = x[:, ::stride, ::stride, :].reshape(N * Ho * Wo, C)
    else:
        # TODO(synk): im2col patches still round-trip HBM (~kh*kw x activation bytes);
        # a direct-conv loader needs overlapping-window (halo) DMA that BlockSpec
        # cannot express -- left for a manual-DMA follow-up.
        xp = jnp.pad(x, ((0, 0), (pad, pad), (pad, pad), (0, 0)))
        cols = [xp[:, i:i + Ho * stride:stride, j:j + Wo * stride:stride, :]
                for i in range(kh) for j in range(kw)]
        patches = jnp.concatenate(cols, axis=-1).reshape(N * Ho * Wo, kh * kw * C)
    res2d = None if residual is None else residual.reshape(N * Ho * Wo, prep['cout_pad'])
    out = matmul_fused(patches, prep['w'], prep['scale'], prep['bias'],
                       relu=relu, residual=res2d)
    return out.reshape(N, Ho, Wo, prep['cout_pad'])


# ----------------------------------------------------------------------------
# Deterministic parameter construction (shapes of torchvision resnet50 + new head)
# ----------------------------------------------------------------------------
def init_conv(key, o, i, kh, kw):
    std = (2.0 / (i * kh * kw)) ** 0.5          # kaiming-normal (fan_in, relu)
    return jax.random.normal(key, (o, i, kh, kw), jnp.float32) * std


def init_bn(c):
    # PyTorch defaults: weight=1, bias=0, running_mean=0, running_var=1
    return (jnp.ones((c,), jnp.float32), jnp.zeros((c,), jnp.float32),
            jnp.zeros((c,), jnp.float32), jnp.ones((c,), jnp.float32))


def make_resnet50_params(key):
    keys = iter(jax.random.split(key, 256))
    params = {'conv1': init_conv(next(keys), 64, 3, 7, 7), 'bn1': init_bn(64)}
    layers_cfg = [(64, 3, 1), (128, 4, 2), (256, 6, 2), (512, 3, 2)]
    inplanes = 64
    layers = []
    for planes, blocks, stride in layers_cfg:
        blk_list = []
        for b in range(blocks):
            s = stride if b == 0 else 1
            blk = {
                'stride': s,
                'conv1': init_conv(next(keys), planes, inplanes, 1, 1),
                'bn1': init_bn(planes),
                'conv2': init_conv(next(keys), planes, planes, 3, 3),
                'bn2': init_bn(planes),
                'conv3': init_conv(next(keys), planes * 4, planes, 1, 1),
                'bn3': init_bn(planes * 4),
            }
            if s != 1 or inplanes != planes * 4:
                blk['down_conv'] = init_conv(next(keys), planes * 4, inplanes, 1, 1)
                blk['down_bn'] = init_bn(planes * 4)
            blk_list.append(blk)
            inplanes = planes * 4
        layers.append(blk_list)
    params['layers'] = layers

    # fc head: Linear(2048, 1024), Linear(1024, 12)  (PyTorch default uniform init)
    k1, k2, k3, k4 = jax.random.split(next(keys), 4)
    b1 = 1.0 / (2048 ** 0.5)
    params['fc1_w'] = jax.random.uniform(k1, (2048, 1024), jnp.float32, -b1, b1)
    params['fc1_b'] = jax.random.uniform(k2, (1024,), jnp.float32, -b1, b1)
    b2 = 1.0 / (1024 ** 0.5)
    params['fc2_w'] = jax.random.uniform(k3, (1024, 12), jnp.float32, -b2, b2)
    params['fc2_b'] = jax.random.uniform(k4, (12,), jnp.float32, -b2, b2)
    return params


# ----------------------------------------------------------------------------
# One-time parameter preparation: fold BN, absorb carried channel padding,
# transpose, pad to 128-multiples, cast weights to bf16
# ----------------------------------------------------------------------------
def bn_fold(gamma, beta, mean, var):
    scale = gamma / jnp.sqrt(var + EPS)
    bias = beta - mean * scale
    return scale, bias


def _prep_conv(w_oihw, bn, stride, pad, cin_pad):
    """cin_pad: channel count the incoming activation actually carries (>= real Cin);
    the extra input channels get zero weight rows so no activation slicing is needed."""
    O, I, kh, kw = w_oihw.shape
    scale, bias = bn_fold(*bn)
    w_t = jnp.transpose(w_oihw, (2, 3, 1, 0))                    # (kh, kw, I, O)
    if cin_pad != I:
        w_t = jnp.pad(w_t, ((0, 0), (0, 0), (0, cin_pad - I), (0, 0)))
    K = kh * kw * cin_pad
    w2 = w_t.reshape(K, O)
    Kp, Np = _round_up(K, 128), _round_up(O, 128)
    w2 = jnp.pad(w2, ((0, Kp - K), (0, Np - O))).astype(jnp.bfloat16)
    scale = jnp.pad(scale.astype(jnp.float32), (0, Np - O)).reshape(1, Np)
    bias = jnp.pad(bias.astype(jnp.float32), (0, Np - O)).reshape(1, Np)
    return {'w': w2, 'scale': scale, 'bias': bias, 'kh': kh, 'kw': kw,
            'stride': stride, 'pad': pad, 'cout_pad': Np}


def prepare_params(params):
    prep = {'conv1': _prep_conv(params['conv1'], params['bn1'], 2, 3, cin_pad=3)}
    c = prep['conv1']['cout_pad']                # 128 (64 real + 64 zero), carried
    layers = []
    for layer in params['layers']:
        blks = []
        for blk in layer:
            p = {'conv1': _prep_conv(blk['conv1'], blk['bn1'], 1, 0, cin_pad=c)}
            p['conv2'] = _prep_conv(blk['conv2'], blk['bn2'], blk['stride'], 1,
                                    cin_pad=p['conv1']['cout_pad'])
            p['conv3'] = _prep_conv(blk['conv3'], blk['bn3'], 1, 0,
                                    cin_pad=p['conv2']['cout_pad'])
            if 'down_conv' in blk:
                p['down'] = _prep_conv(blk['down_conv'], blk['down_bn'],
                                       blk['stride'], 0, cin_pad=c)
            blks.append(p)
            c = p['conv3']['cout_pad']
        layers.append(blks)
    prep['layers'] = layers
    # fc head stays in plain f32 for XLA (perf review: Pallas launch is pure overhead
    # at M = batch <= 16 rows).
    prep['fc1_w'], prep['fc1_b'] = params['fc1_w'], params['fc1_b']
    prep['fc2_w'], prep['fc2_b'] = params['fc2_w'], params['fc2_b']
    return prep


# ----------------------------------------------------------------------------
# Forward pass
# ----------------------------------------------------------------------------
def bottleneck(x, blk):
    out = conv_bn(x, blk['conv1'], relu=True)
    out = conv_bn(out, blk['conv2'], relu=True)
    identity = conv_bn(x, blk['down'], relu=False) if 'down' in blk else x
    # conv3 + folded BN + residual add + ReLU fused into a single matmul epilogue.
    return conv_bn(out, blk['conv3'], relu=True, residual=identity)


def resnet50_forward(prep, images_nchw):
    # images: NCHW -> NHWC, bf16 activations throughout the backbone
    x = jnp.transpose(images_nchw, (0, 2, 3, 1)).astype(jnp.bfloat16)
    x = conv_bn(x, prep['conv1'], relu=True)             # conv1 + bn1 + relu
    x = maxpool_3x3_s2(x)                                # maxpool (channels stay padded)
    for layer in prep['layers']:                         # layer1..layer4
        for blk in layer:
            x = bottleneck(x, blk)
    feats = jnp.mean(x.astype(jnp.float32), axis=(1, 2))  # adaptive avgpool (1,1) -> (N, 2048)
    # Variable(features.data) is a detach -> no-op for the forward value.
    feats = feats @ prep['fc1_w'] + prep['fc1_b']          # Linear(2048, 1024)
    feats = feats @ prep['fc2_w'] + prep['fc2_b']          # Linear(1024, 12)
    return feats


if __name__ == "__main__":
    key = jax.random.PRNGKey(0)
    pk, xk = jax.random.split(key)
    params = make_resnet50_params(pk)
    prep = prepare_params(params)   # one-time: fold BN, pad channels, bf16 weights
    images = jax.random.normal(xk, (2, 3, 32, 32), jnp.float32)   # small NCHW input
    out = resnet50_forward(prep, images)
    out = jax.block_until_ready(out)
    assert out.shape == (2, 12) and out.dtype == jnp.float32
    print("KERNEL_OK")
</pallas_src>

<mosaic_0001>
module attributes {stable_mosaic.version = 11 : i64} {
  func.func @_mm_kernel(%arg0: i32, %arg1: i32, %arg2: memref<512x256xbf16, #tpu.memory_space<vmem>>, %arg3: memref<256x128xbf16, #tpu.memory_space<vmem>>, %arg4: memref<1x128xf32, #tpu.memory_space<vmem>>, %arg5: memref<1x128xf32, #tpu.memory_space<vmem>>, %arg6: memref<512x128xbf16, #tpu.memory_space<vmem>>) attributes {dimension_semantics = [#tpu.dimension_semantics<parallel>, #tpu.dimension_semantics<parallel>], iteration_bounds = array<i64: 1, 1>, scalar_prefetch = 0 : i64, scratch_operands = 0 : i64, tpu.core_type = #tpu.core_type<tc>, window_params = [{transform_indices = @transform_0, window_bounds = array<i64: 512, 256>}, {transform_indices = @transform_1, window_bounds = array<i64: 256, 128>}, {transform_indices = @transform_2, window_bounds = array<i64: 1, 128>}, {transform_indices = @transform_3, window_bounds = array<i64: 1, 128>}, {transform_indices = @transform_4, window_bounds = array<i64: 512, 128>}]} {
    %c0 = arith.constant 0 : index
    %c0_0 = arith.constant 0 : index
    %0 = vector.load %arg2[%c0, %c0_0] : memref<512x256xbf16, #tpu.memory_space<vmem>>, vector<512x256xbf16>
    %c0_1 = arith.constant 0 : index
    %c0_2 = arith.constant 0 : index
    %1 = vector.load %arg3[%c0_1, %c0_2] : memref<256x128xbf16, #tpu.memory_space<vmem>>, vector<256x128xbf16>
    %cst = arith.constant dense<0.000000e+00> : vector<512x128xf32>
    %2 = tpu.matmul %0, %1, %cst {dimension_numbers = #tpu.dot_dimension_numbers<[1], [0], [0], [1], [0, 0, 1, 1], [], []>} : vector<512x256xbf16>, vector<256x128xbf16>, vector<512x128xf32> -> vector<512x128xf32>
    %c0_3 = arith.constant 0 : index
    %c0_4 = arith.constant 0 : index
    %3 = vector.load %arg4[%c0_3, %c0_4] : memref<1x128xf32, #tpu.memory_space<vmem>>, vector<1x128xf32>
    %4 = vector.broadcast %3 : vector<1x128xf32> to vector<512x128xf32>
    %5 = arith.mulf %2, %4 : vector<512x128xf32>
    %c0_5 = arith.constant 0 : index
    %c0_6 = arith.constant 0 : index
    %6 = vector.load %arg5[%c0_5, %c0_6] : memref<1x128xf32, #tpu.memory_space<vmem>>, vector<1x128xf32>
    %7 = vector.broadcast %6 : vector<1x128xf32> to vector<512x128xf32>
    %8 = arith.addf %5, %7 : vector<512x128xf32>
    %cst_7 = arith.constant 0.000000e+00 : f32
    %9 = vector.broadcast %cst_7 : f32 to vector<512x128xf32>
    %10 = arith.maximumf %8, %9 : vector<512x128xf32>
    %11 = arith.truncf %10 : vector<512x128xf32> to vector<512x128xbf16>
    %c0_8 = arith.constant 0 : index
    %c0_9 = arith.constant 0 : index
    %12 = vector.load %arg6[%c0_8, %c0_9] : memref<512x128xbf16, #tpu.memory_space<vmem>>, vector<512x128xbf16>
    tpu.vector_store %arg6[%c0_8, %c0_9], %11 {strides = array<i32>} : memref<512x128xbf16, #tpu.memory_space<vmem>>, vector<512x128xbf16>,
    return
  }
  func.func @transform_0(%arg0: i32, %arg1: i32) -> (i32, i32) {
    %c0_i32 = arith.constant 0 : i32
    %c0_i32_0 = arith.constant 0 : i32
    return %arg0, %c0_i32 : i32, i32
  }
  func.func @transform_1(%arg0: i32, %arg1: i32) -> (i32, i32) {
    %c0_i32 = arith.constant 0 : i32
    %c0_i32_0 = arith.constant 0 : i32
    return %c0_i32, %arg1 : i32, i32
  }
  func.func @transform_2(%arg0: i32, %arg1: i32) -> (i32, i32) {
    %c0_i32 = arith.constant 0 : i32
    %c0_i32_0 = arith.constant 0 : i32
    return %c0_i32, %arg1 : i32, i32
  }
  func.func @transform_3(%arg0: i32, %arg1: i32) -> (i32, i32) {
    %c0_i32 = arith.constant 0 : i32
    %c0_i32_0 = arith.constant 0 : i32
    return %c0_i32, %arg1 : i32, i32
  }
  func.func @transform_4(%arg0: i32, %arg1: i32) -> (i32, i32) {
    %c0_i32 = arith.constant 0 : i32
    return %arg0, %arg1 : i32, i32
  }
}

</mosaic_0001>

<bundles_post_ra>
// kernel: tpu_custom_call.1
= control target key start
LH: loop header
LB: loop body
LE: loop exit
PB: predicated region body
PF: predicated region fallthrough
CT: control target
= control target key end

     0   :  { %9 = vsyncpa [#allocation3], 0  ;;  %s2262_s0 = inlined_call_operand.hbm [shape: bf16[512,256], index: 0, kind: input, shape index: {}]   ;;  %s2263_s1 = inlined_call_operand.hbm [shape: bf16[256,128], index: 1, kind: input, shape index: {}]   ;;  %s2264_s2 = inlined_call_operand.vmem [shape: f32[1,128], index: 2, kind: input, shape index: {}]   ;;  %s2265_s3 = inlined_call_operand.vmem [shape: f32[1,128], index: 3, kind: input, shape index: {}]   ;;  %s2266_s4 = inlined_call_operand.hbm [shape: bf16[512,128], index: 4, kind: output, shape index: {}]  }
   0x1   :  { %10 = vsyncpa [#allocation6], 0 }
   0x2   :  { %11 = vsyncpa [#allocation4], 0  ;;  %s2017_s15 = smov [#allocation2]   ;;  %s1945_s19 = scalar_lea.hbm %s2262_s0, 8192 }
   0x3   :  { %s17_s16 = sshll.u32 %s2017_s15, 4  ;;  %p1946_p0 = scmp.ne.s32.totalorder %s2262_s0, %s1945_s19  ;;  %s18_s16 = int_to_ptr.vmem [resolvable:$true] %s17_s16 }
   0x4   :  { %p1949_p1 = scmp.lt.u32.totalorder %s1945_s19, %s2262_s0 }
   0x6   :  { %p1951_p2 = pnand %p1949_p1, %p1946_p0 }
   0x8   :  { %1954 = shalt.err (!%p1951_p2)
}
   0x9   :  { %s1955_s24 = scalar_lea.vmem %s18_s16, 8192  ;;  %p1960_p4 = scmp.lt.s32.totalorder %s18_s16, %s18_s16 }
   0xa   :  { %p1956_p3 = scmp.ne.s32.totalorder %s18_s16, %s1955_s24  ;;  %p1961_p5 = scmp.lt.s32.totalorder %s1955_s24, %s1955_s24 }
   0xc   :  { %p1962_p6 = por %p1961_p5, %p1960_p4 }
   0xe   :  { %p1963_p7 = pnand %p1962_p6, %p1956_p3 }
  0x10   :  { %1966 = shalt.err (!%p1963_p7)
}
  0x11   :  { %s2018_s25 = smov 128   ;;  %s2019_s26 = smov 8  }
  0x12   :  { %23 = dma.hbm_to_vmem [thread:$0]  %s2262_s0, 8192, %s18_s16, [#allocation3], %s2018_s25, %s2018_s25, %s2019_s26  }
  0x13   :  { %s2020_s29 = smov [#allocation5]   ;;  %s1967_s7 = scalar_lea.hbm %s2263_s1, 2048 }
  0x14   :  { %s29_s30 = sshll.u32 %s2020_s29, 4  ;;  %p1968_p8 = scmp.ne.s32.totalorder %s2263_s1, %s1967_s7  ;;  %s30_s30 = int_to_ptr.vmem [resolvable:$true] %s29_s30 }
  0x15   :  { %p1971_p9 = scmp.lt.u32.totalorder %s1967_s7, %s2263_s1 }
  0x17   :  { %p1973_p10 = pnand %p1971_p9, %p1968_p8 }
  0x19   :  { %1976 = shalt.err (!%p1973_p10)
}
  0x1a   :  { %s1977_s12 = scalar_lea.vmem %s30_s30, 2048  ;;  %p1982_p12 = scmp.lt.s32.totalorder %s30_s30, %s30_s30 }
  0x1b   :  { %p1978_p11 = scmp.ne.s32.totalorder %s30_s30, %s1977_s12  ;;  %p1983_p13 = scmp.lt.s32.totalorder %s1977_s12, %s1977_s12 }
  0x1d   :  { %p1984_p0 = por %p1983_p13, %p1982_p12 }
  0x1f   :  { %p1985_p1 = pnand %p1984_p0, %p1978_p11 }
  0x21   :  { %1988 = shalt.err (!%p1985_p1)
}
  0x22   :  { %s2021_s0 = smov 64   ;;  %s2022_s13 = smov 4  }
  0x23   :  { %35 = dma.hbm_to_vmem [thread:$0]  %s2263_s1, 2048, %s30_s30, [#allocation6], %s2021_s0, %s2021_s0, %s2022_s13  }
  0x24   :  { %2011 = dma.done.wait [#allocation3], 8192  }
  0x25   :  { %2012 = vsyncadd [#allocation3], 4294959104 }
  0x26   :  { %2013 = dma.done.wait [#allocation6], 2048  }
  0x27   :  { %2014 = vsyncadd [#allocation6], 4294965248  ;;  %v2023_v0 = vmov 0   ;;  %v1833_v1 = vld [vmem:[#allocation5] sm:$0xff]   ;;  %v1834_v2 = vld [vmem:[#allocation5 + $0x8] sm:$0xff]  }
  0x28   :  { %559 = vmatprep.subr.bf16.mxu0 %v2023_v0  ;;  %1793 = vmatprep.subr.bf16.mxu1 %v2023_v0  ;;  %v1835_v3 = vld [vmem:[#allocation5 + $0x10] sm:$0xff]   ;;  %v1836_v4 = vld [vmem:[#allocation5 + $0x18] sm:$0xff]   ;;  %v1837_v5 = vld [vmem:[#allocation5 + $0x20] sm:$0xff]  }
  0x29   :  { %560 = vmatpush1.bf16.msra.mxu0 %v1833_v1  ;;  %1809 = vmatpush1.bf16.msra.mxu1 %v1833_v1  ;;  %v1851_v6 = vld [vmem:[#allocation2 + $0x4] ss:$8 sps:$4 sm:$0xff]   ;;  %v1839_v9 = vld [vmem:[#allocation5 + $0x30] sm:$0xff]   ;;  %v1840_v10 = vld [vmem:[#allocation5 + $0x38] sm:$0xff]  }
  0x2a   :  { %561 = vmatprep.subr.bf16.mxu0 %v2023_v0  ;;  %1794 = vmatprep.subr.bf16.mxu1 %v2023_v0  ;;  %v1838_v7 = vld [vmem:[#allocation5 + $0x28] sm:$0xff]   ;;  %v1841_v11 = vld [vmem:[#allocation5 + $0x40] sm:$0xff]   ;;  %v1843_v13 = vld [vmem:[#allocation5 + $0x50] sm:$0xff]  }
  0x2b   :  { %v1854_v8 = vld [vmem:[#allocation2 + $0x104] ss:$8 sps:$4 sm:$0xff]   ;;  %591 = vmatprep.mubr.bf16.mxu0 %v1851_v6  ;;  %v1844_v14 = vld [vmem:[#allocation5 + $0x58] sm:$0xff]   ;;  %v1847_v17 = vld [vmem:[#allocation5 + $0x70] sm:$0xff]  }
  0x2c   :  { %719 = vmatprep.mubr.bf16.mxu1 %v1854_v8  ;;  %v1842_v12 = vld [vmem:[#allocation5 + $0x48] sm:$0xff]   ;;  %v1845_v15 = vld [vmem:[#allocation5 + $0x60] sm:$0xff]   ;;  %v1848_v18 = vld [vmem:[#allocation5 + $0x78] sm:$0xff]  }
  0x2d   :  { %562 = vmatpush1.bf16.msra.mxu0 %v1834_v2  ;;  %1810 = vmatpush1.bf16.msra.mxu1 %v1834_v2  ;;  %v1846_v16 = vld [vmem:[#allocation5 + $0x68] sm:$0xff]   ;;  %v1855_v21 = vld [vmem:[#allocation2 + $0x14] ss:$8 sps:$4 sm:$0xff]   ;;  %v1859_v23 = vld [vmem:[#allocation2 + $0x10] ss:$8 sps:$4 sm:$0xff]  }
  0x2e   :  { %563 = vmatprep.subr.bf16.mxu0 %v2023_v0  ;;  %1795 = vmatprep.subr.bf16.mxu1 %v2023_v0  ;;  %v1849_v19 = vld [vmem:[#allocation2] ss:$8 sps:$4 sm:$0xff]   ;;  %v1857_v22 = vld [vmem:[#allocation2 + $0x114] ss:$8 sps:$4 sm:$0xff]   ;;  %v1860_v24 = vld [vmem:[#allocation2 + $0x110] ss:$8 sps:$4 sm:$0xff]  }
  0x2f   :  { %v1852_v20 = vld [vmem:[#allocation2 + $0x100] ss:$8 sps:$4 sm:$0xff]   ;;  %v1861_v25 = vld [vmem:[#allocation2 + $0x24] ss:$8 sps:$4 sm:$0xff]   ;;  %v1867_v29 = vld [vmem:[#allocation2 + $0x34] ss:$8 sps:$4 sm:$0xff]  }
  0x30   :  { %v1863_v26 = vld [vmem:[#allocation2 + $0x124] ss:$8 sps:$4 sm:$0xff]   ;;  %v1865_v27 = vld [vmem:[#allocation2 + $0x20] ss:$8 sps:$4 sm:$0xff]   ;;  %v1869_v30 = vld [vmem:[#allocation2 + $0x134] ss:$8 sps:$4 sm:$0xff]  }
  0x31   :  { %564 = vmatpush1.bf16.msra.mxu0 %v1835_v3  ;;  %1811 = vmatpush1.bf16.msra.mxu1 %v1835_v3  ;;  %v1866_v28 = vld [vmem:[#allocation2 + $0x120] ss:$8 sps:$4 sm:$0xff]   ;;  %v1871_v31 = vld [vmem:[#allocation2 + $0x30] ss:$8 sps:$4 sm:$0xff]   ;;  %v1873_v33 = vld [vmem:[#allocation2 + $0x44] ss:$8 sps:$4 sm:$0xff]  }
  0x32   :  { %565 = vmatprep.subr.bf16.mxu0 %v2023_v0  ;;  %1796 = vmatprep.subr.bf16.mxu1 %v2023_v0  ;;  %v1872_v32 = vld [vmem:[#allocation2 + $0x130] ss:$8 sps:$4 sm:$0xff]   ;;  %v1875_v34 = vld [vmem:[#allocation2 + $0x144] ss:$8 sps:$4 sm:$0xff]   ;;  %v1877_v35 = vld [vmem:[#allocation2 + $0x40] ss:$8 sps:$4 sm:$0xff]  }
  0x33   :  { %v1878_v36 = vld [vmem:[#allocation2 + $0x140] ss:$8 sps:$4 sm:$0xff]   ;;  %v1879_v37 = vld [vmem:[#allocation2 + $0x54] ss:$8 sps:$4 sm:$0xff]   ;;  %v1883_v39 = vld [vmem:[#allocation2 + $0x50] ss:$8 sps:$4 sm:$0xff]  }
  0x34   :  { %v1881_v38 = vld [vmem:[#allocation2 + $0x154] ss:$8 sps:$4 sm:$0xff]   ;;  %v1884_v40 = vld [vmem:[#allocation2 + $0x150] ss:$8 sps:$4 sm:$0xff]   ;;  %v1885_v41 = vld [vmem:[#allocation2 + $0x64] ss:$8 sps:$4 sm:$0xff]  }
  0x35   :  { %566 = vmatpush1.bf16.msra.mxu0 %v1836_v4  ;;  %1812 = vmatpush1.bf16.msra.mxu1 %v1836_v4  ;;  %v1887_v42 = vld [vmem:[#allocation2 + $0x164] ss:$8 sps:$4 sm:$0xff]   ;;  %v1889_v43 = vld [vmem:[#allocation2 + $0x60] ss:$8 sps:$4 sm:$0xff]   ;;  %v1891_v45 = vld [vmem:[#allocation2 + $0x74] ss:$8 sps:$4 sm:$0xff]  }
  0x36   :  { %567 = vmatprep.subr.bf16.mxu0 %v2023_v0  ;;  %1797 = vmatprep.subr.bf16.mxu1 %v2023_v0  ;;  %v1890_v44 = vld [vmem:[#allocation2 + $0x160] ss:$8 sps:$4 sm:$0xff]   ;;  %v1893_v46 = vld [vmem:[#allocation2 + $0x174] ss:$8 sps:$4 sm:$0xff]   ;;  %v1895_v47 = vld [vmem:[#allocation2 + $0x70] ss:$8 sps:$4 sm:$0xff]  }
  0x37   :  { %v1896_v48 = vld [vmem:[#allocation2 + $0x170] ss:$8 sps:$4 sm:$0xff]   ;;  %v1897_v49 = vld [vmem:[#allocation2 + $0x84] ss:$8 sps:$4 sm:$0xff]   ;;  %v1901_v51 = vld [vmem:[#allocation2 + $0x80] ss:$8 sps:$4 sm:$0xff]  }
  0x38   :  { %v1899_v50 = vld [vmem:[#allocation2 + $0x184] ss:$8 sps:$4 sm:$0xff]   ;;  %v1902_v52 = vld [vmem:[#allocation2 + $0x180] ss:$8 sps:$4 sm:$0xff]   ;;  %v1903_v53 = vld [vmem:[#allocation2 + $0x94] ss:$8 sps:$4 sm:$0xff]  }
  0x39   :  { %568 = vmatpush1.bf16.msra.mxu0 %v1837_v5  ;;  %1813 = vmatpush1.bf16.msra.mxu1 %v1837_v5  ;;  %v1905_v54 = vld [vmem:[#allocation2 + $0x194] ss:$8 sps:$4 sm:$0xff]   ;;  %v1907_v55 = vld [vmem:[#allocation2 + $0x90] ss:$8 sps:$4 sm:$0xff]   ;;  %v1909_v57 = vld [vmem:[#allocation2 + $0xa4] ss:$8 sps:$4 sm:$0xff]  }
  0x3a   :  { %569 = vmatprep.subr.bf16.mxu0 %v2023_v0  ;;  %1798 = vmatprep.subr.bf16.mxu1 %v2023_v0  ;;  %v1908_v56 = vld [vmem:[#allocation2 + $0x190] ss:$8 sps:$4 sm:$0xff]   ;;  %v1911_v58 = vld [vmem:[#allocation2 + $0x1a4] ss:$8 sps:$4 sm:$0xff]   ;;  %v1913_v59 = vld [vmem:[#allocation2 + $0xa0] ss:$8 sps:$4 sm:$0xff]  }
  0x3b   :  { %v1914_v60 = vld [vmem:[#allocation2 + $0x1a0] ss:$8 sps:$4 sm:$0xff]   ;;  %v1915_v61 = vld [vmem:[#allocation2 + $0xb4] ss:$8 sps:$4 sm:$0xff]   ;;  %v1919_v63 = vld [vmem:[#allocation2 + $0xb0] ss:$8 sps:$4 sm:$0xff]  }
  0x3c   :  { %v1917_v62 = vld [vmem:[#allocation2 + $0x1b4] ss:$8 sps:$4 sm:$0xff]   ;;  %v1921_v1 = vld [vmem:[#allocation2 + $0xc4] ss:$8 sps:$4 sm:$0xff]   ;;  %v1925_v3 = vld [vmem:[#allocation2 + $0xc0] ss:$8 sps:$4 sm:$0xff]  }
  0x3d   :  { %570 = vmatpush1.bf16.msra.mxu0 %v1838_v7  ;;  %1814 = vmatpush1.bf16.msra.mxu1 %v1838_v7  ;;  %v1923_v2 = vld [vmem:[#allocation2 + $0x1c4] ss:$8 sps:$4 sm:$0xff]   ;;  %v1926_v4 = vld [vmem:[#allocation2 + $0x1c0] ss:$8 sps:$4 sm:$0xff]   ;;  %v1927_v5 = vld [vmem:[#allocation2 + $0xd4] ss:$8 sps:$4 sm:$0xff]  }
  0x3e   :  { %571 = vmatprep.subr.bf16.mxu0 %v2023_v0  ;;  %1799 = vmatprep.subr.bf16.mxu1 %v2023_v0  ;;  %v1929_v6 = vld [vmem:[#allocation2 + $0x1d4] ss:$8 sps:$4 sm:$0xff]   ;;  %v1931_v7 = vld [vmem:[#allocation2 + $0xd0] ss:$8 sps:$4 sm:$0xff]  }
  0x3f   :  { %v1932_v8 = vld [vmem:[#allocation2 + $0x1d0] ss:$8 sps:$4 sm:$0xff]  }
  0x41   :  { %572 = vmatpush1.bf16.msra.mxu0 %v1839_v9  ;;  %1815 = vmatpush1.bf16.msra.mxu1 %v1839_v9  ;;  %v1933_v9 = vld [vmem:[#allocation2 + $0xe4] ss:$8 sps:$4 sm:$0xff]  }
  0x42   :  { %573 = vmatprep.subr.bf16.mxu0 %v2023_v0  ;;  %1800 = vmatprep.subr.bf16.mxu1 %v2023_v0 }
  0x45   :  { %574 = vmatpush1.bf16.msra.mxu0 %v1840_v10  ;;  %1816 = vmatpush1.bf16.msra.mxu1 %v1840_v10  ;;  %v1935_v10 = vld [vmem:[#allocation2 + $0x1e4] ss:$8 sps:$4 sm:$0xff]  }
  0x46   :  { %575 = vmatprep.subr.bf16.mxu0 %v2023_v0  ;;  %1801 = vmatprep.subr.bf16.mxu1 %v2023_v0 }
  0x49   :  { %576 = vmatpush1.bf16.msra.mxu0 %v1841_v11  ;;  %1817 = vmatpush1.bf16.msra.mxu1 %v1841_v11  ;;  %v1937_v11 = vld [vmem:[#allocation2 + $0xe0] ss:$8 sps:$4 sm:$0xff]  }
  0x4a   :  { %577 = vmatprep.subr.bf16.mxu0 %v2023_v0  ;;  %1802 = vmatprep.subr.bf16.mxu1 %v2023_v0 }
  0x4d   :  { %578 = vmatpush1.bf16.msra.mxu0 %v1842_v12  ;;  %1818 = vmatpush1.bf16.msra.mxu1 %v1842_v12  ;;  %v1938_v12 = vld [vmem:[#allocation2 + $0x1e0] ss:$8 sps:$4 sm:$0xff]  }
  0x4e   :  { %579 = vmatprep.subr.bf16.mxu0 %v2023_v0  ;;  %1803 = vmatprep.subr.bf16.mxu1 %v2023_v0 }
  0x51   :  { %580 = vmatpush1.bf16.msra.mxu0 %v1843_v13  ;;  %1819 = vmatpush1.bf16.msra.mxu1 %v1843_v13  ;;  %v1939_v13 = vld [vmem:[#allocation2 + $0xf4] ss:$8 sps:$4 sm:$0xff]  }
  0x52   :  { %581 = vmatprep.subr.bf16.mxu0 %v2023_v0  ;;  %1804 = vmatprep.subr.bf16.mxu1 %v2023_v0 }
  0x55   :  { %582 = vmatpush1.bf16.msra.mxu0 %v1844_v14  ;;  %1820 = vmatpush1.bf16.msra.mxu1 %v1844_v14  ;;  %v1941_v14 = vld [vmem:[#allocation2 + $0x1f4] ss:$8 sps:$4 sm:$0xff]  }
  0x56   :  { %583 = vmatprep.subr.bf16.mxu0 %v2023_v0  ;;  %1805 = vmatprep.subr.bf16.mxu1 %v2023_v0 }
  0x59   :  { %584 = vmatpush1.bf16.msra.mxu0 %v1845_v15  ;;  %1821 = vmatpush1.bf16.msra.mxu1 %v1845_v15  ;;  %v1943_v15 = vld [vmem:[#allocation2 + $0xf0] ss:$8 sps:$4 sm:$0xff]  }
  0x5a   :  { %585 = vmatprep.subr.bf16.mxu0 %v2023_v0  ;;  %1806 = vmatprep.subr.bf16.mxu1 %v2023_v0 }
  0x5d   :  { %586 = vmatpush1.bf16.msra.mxu0 %v1846_v16  ;;  %1822 = vmatpush1.bf16.msra.mxu1 %v1846_v16  ;;  %v1944_v16 = vld [vmem:[#allocation2 + $0x1f0] ss:$8 sps:$4 sm:$0xff]  }
  0x5e   :  { %587 = vmatprep.subr.bf16.mxu0 %v2023_v0  ;;  %1807 = vmatprep.subr.bf16.mxu1 %v2023_v0 }
  0x61   :  { %588 = vmatpush1.bf16.msra.mxu0 %v1847_v17  ;;  %1823 = vmatpush1.bf16.msra.mxu1 %v1847_v17  ;;  %v2112_v17 = vld [vmem:[%s2264_s2] ss:$0 sm:$0xff]  ;;  %s2024_s2 = smov [#allocation7]  }
  0x62   :  { %589 = vmatprep.subr.bf16.mxu0 %v2023_v0  ;;  %1808 = vmatprep.subr.bf16.mxu1 %v2023_v0  ;;  %v1920_v0 = vld [vmem:[#allocation2 + $0x1b0] ss:$8 sps:$4 sm:$0xff]  }
  0x65   :  { %590 = vmatpush1.bf16.msra.mxu0 %v1848_v18  ;;  %1824 = vmatpush1.bf16.msra.mxu1 %v1848_v18 }
  0x68   :  { %592 = vmatmul.mubr.bf16.vlgmr.msra.gmra.mrb[0].mxu0 %v1849_v19  ;;  %720 = vmatmul.mubr.bf16.vlgmr.msra.gmra.mrb[0].mxu1 %v1852_v20  ;;  %v2117_v19 = vld [vmem:[%s2265_s3] ss:$0 sm:$0xff]  ;;  %s1379_s3 = sshll.u32 %s2024_s2, 4  ;;  %s1380_s3 = int_to_ptr.vmem [resolvable:$true] %s1379_s3 }
  0x69   :  { %599 = vmatprep.mubr.bf16.mxu0 %v1855_v21  ;;  %727 = vmatprep.mubr.bf16.mxu1 %v1857_v22  ;;  %s1989_s19 = scalar_lea.vmem %s1380_s3, 4096  ;;  %p1994_p3 = scmp.lt.s32.totalorder %s1380_s3, %s1380_s3 }
  0x6a   :  { %p1990_p2 = scmp.ne.s32.totalorder %s1380_s3, %s1989_s19  ;;  %p1995_p4 = scmp.lt.s32.totalorder %s1989_s19, %s1989_s19 }
  0x6c   :  { %p1996_p5 = por %p1995_p4, %p1994_p3 }
  0x6e   :  { %p1997_p6 = pnand %p1996_p5, %p1990_p2 }
  0x70   :  { %600 = vmatmul.mubr.bf16.gmra.mrb[4].mxu0 %v1859_v23  ;;  %728 = vmatmul.mubr.bf16.gmra.mrb[4].mxu1 %v1860_v24 }
  0x71   :  { %607 = vmatprep.mubr.bf16.mxu0 %v1861_v25  ;;  %735 = vmatprep.mubr.bf16.mxu1 %v1863_v26 }
  0x78   :  { %608 = vmatmul.mubr.bf16.gmra.mrb[8].mxu0 %v1865_v27  ;;  %736 = vmatmul.mubr.bf16.gmra.mrb[8].mxu1 %v1866_v28 }
  0x79   :  { %615 = vmatprep.mubr.bf16.mxu0 %v1867_v29  ;;  %743 = vmatprep.mubr.bf16.mxu1 %v1869_v30 }
  0x80   :  { %616 = vmatmul.mubr.bf16.gmra.mrb[12].mxu0 %v1871_v31  ;;  %744 = vmatmul.mubr.bf16.gmra.mrb[12].mxu1 %v1872_v32 }
  0x81   :  { %623 = vmatprep.mubr.bf16.mxu0 %v1873_v33  ;;  %751 = vmatprep.mubr.bf16.mxu1 %v1875_v34 }
  0x88   :  { %624 = vmatmul.mubr.bf16.gmra.mrb[16].mxu0 %v1877_v35  ;;  %752 = vmatmul.mubr.bf16.gmra.mrb[16].mxu1 %v1878_v36 }
  0x89   :  { %631 = vmatprep.mubr.bf16.mxu0 %v1879_v37  ;;  %759 = vmatprep.mubr.bf16.mxu1 %v1881_v38 }
  0x90   :  { %632 = vmatmul.mubr.bf16.gmra.mrb[20].mxu0 %v1883_v39  ;;  %760 = vmatmul.mubr.bf16.gmra.mrb[20].mxu1 %v1884_v40 }
  0x91   :  { %639 = vmatprep.mubr.bf16.mxu0 %v1885_v41  ;;  %767 = vmatprep.mubr.bf16.mxu1 %v1887_v42 }
  0x98   :  { %640 = vmatmul.mubr.bf16.gmra.mrb[24].mxu0 %v1889_v43  ;;  %768 = vmatmul.mubr.bf16.gmra.mrb[24].mxu1 %v1890_v44 }
  0x99   :  { %647 = vmatprep.mubr.bf16.mxu0 %v1891_v45  ;;  %775 = vmatprep.mubr.bf16.mxu1 %v1893_v46 }
  0xa0   :  { %648 = vmatmul.mubr.bf16.gmra.mrb[28].mxu0 %v1895_v47  ;;  %776 = vmatmul.mubr.bf16.gmra.mrb[28].mxu1 %v1896_v48 }
  0xa1   :  { %655 = vmatprep.mubr.bf16.mxu0 %v1897_v49  ;;  %783 = vmatprep.mubr.bf16.mxu1 %v1899_v50 }
  0xa8   :  { %656 = vmatmul.mubr.bf16.gmra.mrb[32].mxu0 %v1901_v51  ;;  %784 = vmatmul.mubr.bf16.gmra.mrb[32].mxu1 %v1902_v52 }
  0xa9   :  { %663 = vmatprep.mubr.bf16.mxu0 %v1903_v53  ;;  %791 = vmatprep.mubr.bf16.mxu1 %v1905_v54 }
  0xb0   :  { %664 = vmatmul.mubr.bf16.gmra.mrb[36].mxu0 %v1907_v55  ;;  %792 = vmatmul.mubr.bf16.gmra.mrb[36].mxu1 %v1908_v56 }
  0xb1   :  { %671 = vmatprep.mubr.bf16.mxu0 %v1909_v57  ;;  %799 = vmatprep.mubr.bf16.mxu1 %v1911_v58 }
  0xb8   :  { %672 = vmatmul.mubr.bf16.gmra.mrb[40].mxu0 %v1913_v59  ;;  %800 = vmatmul.mubr.bf16.gmra.mrb[40].mxu1 %v1914_v60 }
  0xb9   :  { %679 = vmatprep.mubr.bf16.mxu0 %v1915_v61  ;;  %807 = vmatprep.mubr.bf16.mxu1 %v1917_v62 }
  0xc0   :  { %680 = vmatmul.mubr.bf16.gmra.mrb[44].mxu0 %v1919_v63  ;;  %808 = vmatmul.mubr.bf16.gmra.mrb[44].mxu1 %v1920_v0 }
  0xc1   :  { %687 = vmatprep.mubr.bf16.mxu0 %v1921_v1  ;;  %815 = vmatprep.mubr.bf16.mxu1 %v1923_v2 }
  0xc8   :  { %688 = vmatmul.mubr.bf16.gmra.mrb[48].mxu0 %v1925_v3  ;;  %816 = vmatmul.mubr.bf16.gmra.mrb[48].mxu1 %v1926_v4 }
  0xc9   :  { %695 = vmatprep.mubr.bf16.mxu0 %v1927_v5  ;;  %823 = vmatprep.mubr.bf16.mxu1 %v1929_v6 }
  0xd0   :  { %696 = vmatmul.mubr.bf16.gmra.mrb[52].mxu0 %v1931_v7  ;;  %824 = vmatmul.mubr.bf16.gmra.mrb[52].mxu1 %v1932_v8 }
  0xd1   :  { %703 = vmatprep.mubr.bf16.mxu0 %v1933_v9  ;;  %831 = vmatprep.mubr.bf16.mxu1 %v1935_v10 }
  0xd8   :  { %704 = vmatmul.mubr.bf16.gmra.mrb[56].mxu0 %v1937_v11  ;;  %832 = vmatmul.mubr.bf16.gmra.mrb[56].mxu1 %v1938_v12 }
  0xd9   :  { %711 = vmatprep.mubr.bf16.mxu0 %v1939_v13  ;;  %839 = vmatprep.mubr.bf16.mxu1 %v1941_v14 }
  0xe0   :  { %712 = vmatmul.mubr.bf16.gmra.mrb[60].mxu0 %v1943_v15  ;;  %840 = vmatmul.mubr.bf16.gmra.mrb[60].mxu1 %v1944_v16 }
 0x13b   :  { %v593_v18 = vpop.f32.mrb[0].mxu0  ;;  %v721_v20 = vpop.f32.mrb[0].mxu1 }
 0x13c   :  { %v855_v21 = vmul.f32 %v2112_v17, %v593_v18  ;;  %v887_v22 = vmul.f32 %v2112_v17, %v721_v20  ;;  %v595_v23 = vpop.f32.mrb[1].mxu0  ;;  %v723_v24 = vpop.f32.mrb[1].mxu1 }
 0x13d   :  { %v596_v25 = vpop.f32.mrb[2].mxu0  ;;  %v724_v26 = vpop.f32.mrb[2].mxu1 }
 0x13e   :  { %v926_v27 = vadd.f32 %v2117_v19, %v855_v21  ;;  %v958_v28 = vadd.f32 %v2117_v19, %v887_v22  ;;  %v856_v29 = vmul.f32 %v2112_v17, %v596_v25  ;;  %v888_v30 = vmul.f32 %v2112_v17, %v724_v26  ;;  %v598_v31 = vpop.f32.mrb[3].mxu0  ;;  %v726_v32 = vpop.f32.mrb[3].mxu1 }
 0x140   :  { %v927_v33 = vadd.f32 %v2117_v19, %v856_v29  ;;  %v959_v34 = vadd.f32 %v2117_v19, %v888_v30  ;;  %v990_v35 = vmax.f32 %v926_v27, 0.0  ;;  %v1022_v36 = vmax.f32 %v958_v28, 0.0 }
 0x142   :  { %v991_v37 = vmax.f32 %v927_v33, 0.0  ;;  %v1023_v38 = vmax.f32 %v959_v34, 0.0 }
 0x143   :  { %v601_v39 = vpop.f32.mrb[4].mxu0  ;;  %v729_v40 = vpop.f32.mrb[4].mxu1 }
 0x144   :  { %v1605_v41 = vpack.c.bf16 %v991_v37, %v990_v35  ;;  %v1685_v42 = vpack.c.bf16 %v1023_v38, %v1022_v36  ;;  %v857_v43 = vmul.f32 %v2112_v17, %v601_v39  ;;  %v889_v44 = vmul.f32 %v2112_v17, %v729_v40  ;;  %v603_v45 = vpop.f32.mrb[5].mxu0  ;;  %v731_v46 = vpop.f32.mrb[5].mxu1 }
 0x145   :  { %v604_v47 = vpop.f32.mrb[6].mxu0  ;;  %v732_v48 = vpop.f32.mrb[6].mxu1 }
 0x146   :  { %1606 = vst [vmem:[#allocation7] sm:$0xff] %v1605_v41   ;;  %1777 = vst [vmem:[#allocation7 + $0x80] sm:$0xff] %v1685_v42   ;;  %v928_v49 = vadd.f32 %v2117_v19, %v857_v43  ;;  %v960_v50 = vadd.f32 %v2117_v19, %v889_v44  ;;  %v858_v51 = vmul.f32 %v2112_v17, %v604_v47  ;;  %v606_v53 = vpop.f32.mrb[7].mxu0  ;;  %v734_v54 = vpop.f32.mrb[7].mxu1 }
 0x147   :  { %v890_v52 = vmul.f32 %v2112_v17, %v732_v48 }
 0x148   :  { %v929_v55 = vadd.f32 %v2117_v19, %v858_v51  ;;  %v992_v57 = vmax.f32 %v928_v49, 0.0  ;;  %v1024_v58 = vmax.f32 %v960_v50, 0.0 }
 0x149   :  { %v961_v56 = vadd.f32 %v2117_v19, %v890_v52 }
 0x14a   :  { %v993_v59 = vmax.f32 %v929_v55, 0.0 }
 0x14b   :  { %v1025_v60 = vmax.f32 %v961_v56, 0.0  ;;  %v609_v61 = vpop.f32.mrb[8].mxu0  ;;  %v737_v62 = vpop.f32.mrb[8].mxu1 }
 0x14c   :  { %v1610_v63 = vpack.c.bf16 %v993_v59, %v992_v57  ;;  %v859_v1 = vmul.f32 %v2112_v17, %v609_v61  ;;  %v891_v2 = vmul.f32 %v2112_v17, %v737_v62  ;;  %v611_v3 = vpop.f32.mrb[9].mxu0  ;;  %v739_v4 = vpop.f32.mrb[9].mxu1 }
 0x14d   :  { %v1690_v0 = vpack.c.bf16 %v1025_v60, %v1024_v58  ;;  %v612_v5 = vpop.f32.mrb[10].mxu0  ;;  %v740_v6 = vpop.f32.mrb[10].mxu1 }
 0x14e   :  { %1762 = vst [vmem:[#allocation7 + $0x8] sm:$0xff] %v1610_v63   ;;  %v930_v7 = vadd.f32 %v2117_v19, %v859_v1  ;;  %v962_v8 = vadd.f32 %v2117_v19, %v891_v2  ;;  %v860_v9 = vmul.f32 %v2112_v17, %v612_v5  ;;  %v892_v10 = vmul.f32 %v2112_v17, %v740_v6  ;;  %v614_v11 = vpop.f32.mrb[11].mxu0  ;;  %v742_v12 = vpop.f32.mrb[11].mxu1 }
 0x14f   :  { %1778 = vst [vmem:[#allocation7 + $0x88] sm:$0xff] %v1690_v0  }
 0x150   :  { %v931_v13 = vadd.f32 %v2117_v19, %v860_v9  ;;  %v963_v14 = vadd.f32 %v2117_v19, %v892_v10  ;;  %v994_v15 = vmax.f32 %v930_v7, 0.0  ;;  %v1026_v16 = vmax.f32 %v962_v8, 0.0 }
 0x152   :  { %v995_v18 = vmax.f32 %v931_v13, 0.0  ;;  %v1027_v20 = vmax.f32 %v963_v14, 0.0 }
 0x153   :  { %v617_v21 = vpop.f32.mrb[12].mxu0  ;;  %v745_v22 = vpop.f32.mrb[12].mxu1 }
 0x154   :  { %v1615_v23 = vpack.c.bf16 %v995_v18, %v994_v15  ;;  %v1695_v24 = vpack.c.bf16 %v1027_v20, %v1026_v16  ;;  %v861_v25 = vmul.f32 %v2112_v17, %v617_v21  ;;  %v893_v26 = vmul.f32 %v2112_v17, %v745_v22  ;;  %v619_v27 = vpop.f32.mrb[13].mxu0  ;;  %v747_v28 = vpop.f32.mrb[13].mxu1 }
 0x155   :  { %v620_v29 = vpop.f32.mrb[14].mxu0  ;;  %v748_v30 = vpop.f32.mrb[14].mxu1 }
 0x156   :  { %1763 = vst [vmem:[#allocation7 + $0x10] sm:$0xff] %v1615_v23   ;;  %1779 = vst [vmem:[#allocation7 + $0x90] sm:$0xff] %v1695_v24   ;;  %v932_v31 = vadd.f32 %v2117_v19, %v861_v25  ;;  %v964_v32 = vadd.f32 %v2117_v19, %v893_v26  ;;  %v862_v33 = vmul.f32 %v2112_v17, %v620_v29  ;;  %v622_v35 = vpop.f32.mrb[15].mxu0  ;;  %v750_v36 = vpop.f32.mrb[15].mxu1 }
 0x157   :  { %v894_v34 = vmul.f32 %v2112_v17, %v748_v30 }
 0x158   :  { %v933_v37 = vadd.f32 %v2117_v19, %v862_v33  ;;  %v996_v39 = vmax.f32 %v932_v31, 0.0  ;;  %v1028_v40 = vmax.f32 %v964_v32, 0.0 }
 0x159   :  { %v965_v38 = vadd.f32 %v2117_v19, %v894_v34 }
 0x15a   :  { %v997_v41 = vmax.f32 %v933_v37, 0.0 }
 0x15b   :  { %v1029_v42 = vmax.f32 %v965_v38, 0.0  ;;  %v625_v43 = vpop.f32.mrb[16].mxu0  ;;  %v753_v44 = vpop.f32.mrb[16].mxu1 }
 0x15c   :  { %v1620_v45 = vpack.c.bf16 %v997_v41, %v996_v39  ;;  %v863_v47 = vmul.f32 %v2112_v17, %v625_v43  ;;  %v895_v48 = vmul.f32 %v2112_v17, %v753_v44  ;;  %v627_v49 = vpop.f32.mrb[17].mxu0  ;;  %v755_v50 = vpop.f32.mrb[17].mxu1 }
 0x15d   :  { %v1700_v46 = vpack.c.bf16 %v1029_v42, %v1028_v40  ;;  %v628_v51 = vpop.f32.mrb[18].mxu0  ;;  %v756_v52 = vpop.f32.mrb[18].mxu1 }
 0x15e   :  { %1764 = vst [vmem:[#allocation7 + $0x18] sm:$0xff] %v1620_v45   ;;  %v934_v53 = vadd.f32 %v2117_v19, %v863_v47  ;;  %v966_v54 = vadd.f32 %v2117_v19, %v895_v48  ;;  %v864_v55 = vmul.f32 %v2112_v17, %v628_v51  ;;  %v896_v56 = vmul.f32 %v2112_v17, %v756_v52  ;;  %v630_v57 = vpop.f32.mrb[19].mxu0  ;;  %v758_v58 = vpop.f32.mrb[19].mxu1 }
 0x15f   :  { %1780 = vst [vmem:[#allocation7 + $0x98] sm:$0xff] %v1700_v46  }
 0x160   :  { %v935_v59 = vadd.f32 %v2117_v19, %v864_v55  ;;  %v967_v60 = vadd.f32 %v2117_v19, %v896_v56  ;;  %v998_v61 = vmax.f32 %v934_v53, 0.0  ;;  %v1030_v62 = vmax.f32 %v966_v54, 0.0 }
 0x162   :  { %v999_v63 = vmax.f32 %v935_v59, 0.0  ;;  %v1031_v0 = vmax.f32 %v967_v60, 0.0 }
 0x163   :  { %v633_v1 = vpop.f32.mrb[20].mxu0  ;;  %v761_v2 = vpop.f32.mrb[20].mxu1 }
 0x164   :  { %v1625_v3 = vpack.c.bf16 %v999_v63, %v998_v61  ;;  %v1705_v4 = vpack.c.bf16 %v1031_v0, %v1030_v62  ;;  %v865_v5 = vmul.f32 %v2112_v17, %v633_v1  ;;  %v897_v6 = vmul.f32 %v2112_v17, %v761_v2  ;;  %v635_v7 = vpop.f32.mrb[21].mxu0  ;;  %v763_v8 = vpop.f32.mrb[21].mxu1 }
 0x165   :  { %v636_v9 = vpop.f32.mrb[22].mxu0  ;;  %v764_v10 = vpop.f32.mrb[22].mxu1 }
 0x166   :  { %1765 = vst [vmem:[#allocation7 + $0x20] sm:$0xff] %v1625_v3   ;;  %1781 = vst [vmem:[#allocation7 + $0xa0] sm:$0xff] %v1705_v4   ;;  %v936_v11 = vadd.f32 %v2117_v19, %v865_v5  ;;  %v968_v12 = vadd.f32 %v2117_v19, %v897_v6  ;;  %v866_v13 = vmul.f32 %v2112_v17, %v636_v9  ;;  %v638_v15 = vpop.f32.mrb[23].mxu0  ;;  %v766_v16 = vpop.f32.mrb[23].mxu1 }
 0x167   :  { %v898_v14 = vmul.f32 %v2112_v17, %v764_v10 }
 0x168   :  { %v937_v18 = vadd.f32 %v2117_v19, %v866_v13  ;;  %v1000_v21 = vmax.f32 %v936_v11, 0.0  ;;  %v1032_v22 = vmax.f32 %v968_v12, 0.0 }
 0x169   :  { %v969_v20 = vadd.f32 %v2117_v19, %v898_v14 }
 0x16a   :  { %v1001_v23 = vmax.f32 %v937_v18, 0.0 }
 0x16b   :  { %v1033_v24 = vmax.f32 %v969_v20, 0.0  ;;  %v641_v25 = vpop.f32.mrb[24].mxu0  ;;  %v769_v26 = vpop.f32.mrb[24].mxu1 }
 0x16c   :  { %v1630_v27 = vpack.c.bf16 %v1001_v23, %v1000_v21  ;;  %v867_v29 = vmul.f32 %v2112_v17, %v641_v25  ;;  %v899_v30 = vmul.f32 %v2112_v17, %v769_v26  ;;  %v643_v31 = vpop.f32.mrb[25].mxu0  ;;  %v771_v32 = vpop.f32.mrb[25].mxu1 }
 0x16d   :  { %v1710_v28 = vpack.c.bf16 %v1033_v24, %v1032_v22  ;;  %v644_v33 = vpop.f32.mrb[26].mxu0  ;;  %v772_v34 = vpop.f32.mrb[26].mxu1 }
 0x16e   :  { %1766 = vst [vmem:[#allocation7 + $0x28] sm:$0xff] %v1630_v27   ;;  %v938_v35 = vadd.f32 %v2117_v19, %v867_v29  ;;  %v970_v36 = vadd.f32 %v2117_v19, %v899_v30  ;;  %v868_v37 = vmul.f32 %v2112_v17, %v644_v33  ;;  %v900_v38 = vmul.f32 %v2112_v17, %v772_v34  ;;  %v646_v39 = vpop.f32.mrb[27].mxu0  ;;  %v774_v40 = vpop.f32.mrb[27].mxu1 }
 0x16f   :  { %1782 = vst [vmem:[#allocation7 + $0xa8] sm:$0xff] %v1710_v28  }
 0x170   :  { %v939_v41 = vadd.f32 %v2117_v19, %v868_v37  ;;  %v971_v42 = vadd.f32 %v2117_v19, %v900_v38  ;;  %v1002_v43 = vmax.f32 %v938_v35, 0.0  ;;  %v1034_v44 = vmax.f32 %v970_v36, 0.0 }
 0x172   :  { %v1003_v45 = vmax.f32 %v939_v41, 0.0  ;;  %v1035_v46 = vmax.f32 %v971_v42, 0.0 }
 0x173   :  { %v649_v47 = vpop.f32.mrb[28].mxu0  ;;  %v777_v48 = vpop.f32.mrb[28].mxu1 }
 0x174   :  { %v1635_v49 = vpack.c.bf16 %v1003_v45, %v1002_v43  ;;  %v1715_v50 = vpack.c.bf16 %v1035_v46, %v1034_v44  ;;  %v869_v51 = vmul.f32 %v2112_v17, %v649_v47  ;;  %v901_v52 = vmul.f32 %v2112_v17, %v777_v48  ;;  %v651_v53 = vpop.f32.mrb[29].mxu0  ;;  %v779_v54 = vpop.f32.mrb[29].mxu1 }
 0x175   :  { %v652_v55 = vpop.f32.mrb[30].mxu0  ;;  %v780_v56 = vpop.f32.mrb[30].mxu1 }
 0x176   :  { %1767 = vst [vmem:[#allocation7 + $0x30] sm:$0xff] %v1635_v49   ;;  %1783 = vst [vmem:[#allocation7 + $0xb0] sm:$0xff] %v1715_v50   ;;  %v940_v57 = vadd.f32 %v2117_v19, %v869_v51  ;;  %v972_v58 = vadd.f32 %v2117_v19, %v901_v52  ;;  %v870_v59 = vmul.f32 %v2112_v17, %v652_v55  ;;  %v654_v61 = vpop.f32.mrb[31].mxu0  ;;  %v782_v62 = vpop.f32.mrb[31].mxu1 }
 0x177   :  { %v902_v60 = vmul.f32 %v2112_v17, %v780_v56 }
 0x178   :  { %v941_v63 = vadd.f32 %v2117_v19, %v870_v59  ;;  %v1004_v1 = vmax.f32 %v940_v57, 0.0  ;;  %v1036_v2 = vmax.f32 %v972_v58, 0.0 }
 0x179   :  { %v973_v0 = vadd.f32 %v2117_v19, %v902_v60 }
 0x17a   :  { %v1005_v3 = vmax.f32 %v941_v63, 0.0 }
 0x17b   :  { %v1037_v4 = vmax.f32 %v973_v0, 0.0  ;;  %v657_v5 = vpop.f32.mrb[32].mxu0  ;;  %v785_v6 = vpop.f32.mrb[32].mxu1 }
 0x17c   :  { %v1640_v7 = vpack.c.bf16 %v1005_v3, %v1004_v1  ;;  %v871_v9 = vmul.f32 %v2112_v17, %v657_v5  ;;  %v903_v10 = vmul.f32 %v2112_v17, %v785_v6  ;;  %v659_v11 = vpop.f32.mrb[33].mxu0  ;;  %v787_v12 = vpop.f32.mrb[33].mxu1 }
 0x17d   :  { %v1720_v8 = vpack.c.bf16 %v1037_v4, %v1036_v2  ;;  %v660_v13 = vpop.f32.mrb[34].mxu0  ;;  %v788_v14 = vpop.f32.mrb[34].mxu1 }
 0x17e   :  { %1768 = vst [vmem:[#allocation7 + $0x38] sm:$0xff] %v1640_v7   ;;  %v942_v15 = vadd.f32 %v2117_v19, %v871_v9  ;;  %v974_v16 = vadd.f32 %v2117_v19, %v903_v10  ;;  %v872_v18 = vmul.f32 %v2112_v17, %v660_v13  ;;  %v904_v20 = vmul.f32 %v2112_v17, %v788_v14  ;;  %v662_v21 = vpop.f32.mrb[35].mxu0  ;;  %v790_v22 = vpop.f32.mrb[35].mxu1 }
 0x17f   :  { %1784 = vst [vmem:[#allocation7 + $0xb8] sm:$0xff] %v1720_v8  }
 0x180   :  { %v943_v23 = vadd.f32 %v2117_v19, %v872_v18  ;;  %v975_v24 = vadd.f32 %v2117_v19, %v904_v20  ;;  %v1006_v25 = vmax.f32 %v942_v15, 0.0  ;;  %v1038_v26 = vmax.f32 %v974_v16, 0.0 }
 0x182   :  { %v1007_v27 = vmax.f32 %v943_v23, 0.0  ;;  %v1039_v28 = vmax.f32 %v975_v24, 0.0 }
 0x183   :  { %v665_v29 = vpop.f32.mrb[36].mxu0  ;;  %v793_v30 = vpop.f32.mrb[36].mxu1 }
 0x184   :  { %v1645_v31 = vpack.c.bf16 %v1007_v27, %v1006_v25  ;;  %v1725_v32 = vpack.c.bf16 %v1039_v28, %v1038_v26  ;;  %v873_v33 = vmul.f32 %v2112_v17, %v665_v29  ;;  %v905_v34 = vmul.f32 %v2112_v17, %v793_v30  ;;  %v667_v35 = vpop.f32.mrb[37].mxu0  ;;  %v795_v36 = vpop.f32.mrb[37].mxu1 }
 0x185   :  { %v668_v37 = vpop.f32.mrb[38].mxu0  ;;  %v796_v38 = vpop.f32.mrb[38].mxu1 }
 0x186   :  { %1769 = vst [vmem:[#allocation7 + $0x40] sm:$0xff] %v1645_v31   ;;  %1785 = vst [vmem:[#allocation7 + $0xc0] sm:$0xff] %v1725_v32   ;;  %v944_v39 = vadd.f32 %v2117_v19, %v873_v33  ;;  %v976_v40 = vadd.f32 %v2117_v19, %v905_v34  ;;  %v874_v41 = vmul.f32 %v2112_v17, %v668_v37  ;;  %v670_v43 = vpop.f32.mrb[39].mxu0  ;;  %v798_v44 = vpop.f32.mrb[39].mxu1 }
 0x187   :  { %v906_v42 = vmul.f32 %v2112_v17, %v796_v38 }
 0x188   :  { %v945_v45 = vadd.f32 %v2117_v19, %v874_v41  ;;  %v1008_v47 = vmax.f32 %v944_v39, 0.0  ;;  %v1040_v48 = vmax.f32 %v976_v40, 0.0 }
 0x189   :  { %v977_v46 = vadd.f32 %v2117_v19, %v906_v42 }
 0x18a   :  { %v1009_v49 = vmax.f32 %v945_v45, 0.0 }
 0x18b   :  { %v1041_v50 = vmax.f32 %v977_v46, 0.0  ;;  %v673_v51 = vpop.f32.mrb[40].mxu0  ;;  %v801_v52 = vpop.f32.mrb[40].mxu1 }
 0x18c   :  { %v1650_v53 = vpack.c.bf16 %v1009_v49, %v1008_v47  ;;  %v875_v55 = vmul.f32 %v2112_v17, %v673_v51  ;;  %v907_v56 = vmul.f32 %v2112_v17, %v801_v52  ;;  %v675_v57 = vpop.f32.mrb[41].mxu0  ;;  %v803_v58 = vpop.f32.mrb[41].mxu1 }
 0x18d   :  { %v1730_v54 = vpack.c.bf16 %v1041_v50, %v1040_v48  ;;  %v676_v59 = vpop.f32.mrb[42].mxu0  ;;  %v804_v60 = vpop.f32.mrb[42].mxu1 }
 0x18e   :  { %1770 = vst [vmem:[#allocation7 + $0x48] sm:$0xff] %v1650_v53   ;;  %v946_v61 = vadd.f32 %v2117_v19, %v875_v55  ;;  %v978_v62 = vadd.f32 %v2117_v19, %v907_v56  ;;  %v876_v63 = vmul.f32 %v2112_v17, %v676_v59  ;;  %v908_v0 = vmul.f32 %v2112_v17, %v804_v60  ;;  %v678_v1 = vpop.f32.mrb[43].mxu0  ;;  %v806_v2 = vpop.f32.mrb[43].mxu1 }
 0x18f   :  { %1786 = vst [vmem:[#allocation7 + $0xc8] sm:$0xff] %v1730_v54  }
 0x190   :  { %v947_v3 = vadd.f32 %v2117_v19, %v876_v63  ;;  %v979_v4 = vadd.f32 %v2117_v19, %v908_v0  ;;  %v1010_v5 = vmax.f32 %v946_v61, 0.0  ;;  %v1042_v6 = vmax.f32 %v978_v62, 0.0 }
 0x192   :  { %v1011_v7 = vmax.f32 %v947_v3, 0.0  ;;  %v1043_v8 = vmax.f32 %v979_v4, 0.0 }
 0x193   :  { %v681_v9 = vpop.f32.mrb[44].mxu0  ;;  %v809_v10 = vpop.f32.mrb[44].mxu1 }
 0x194   :  { %v1655_v11 = vpack.c.bf16 %v1011_v7, %v1010_v5  ;;  %v1735_v12 = vpack.c.bf16 %v1043_v8, %v1042_v6  ;;  %v877_v13 = vmul.f32 %v2112_v17, %v681_v9  ;;  %v909_v14 = vmul.f32 %v2112_v17, %v809_v10  ;;  %v683_v15 = vpop.f32.mrb[45].mxu0  ;;  %v811_v16 = vpop.f32.mrb[45].mxu1 }
 0x195   :  { %v684_v18 = vpop.f32.mrb[46].mxu0  ;;  %v812_v20 = vpop.f32.mrb[46].mxu1 }
 0x196   :  { %1771 = vst [vmem:[#allocation7 + $0x50] sm:$0xff] %v1655_v11   ;;  %1787 = vst [vmem:[#allocation7 + $0xd0] sm:$0xff] %v1735_v12   ;;  %v948_v21 = vadd.f32 %v2117_v19, %v877_v13  ;;  %v980_v22 = vadd.f32 %v2117_v19, %v909_v14  ;;  %v878_v23 = vmul.f32 %v2112_v17, %v684_v18  ;;  %v686_v25 = vpop.f32.mrb[47].mxu0  ;;  %v814_v26 = vpop.f32.mrb[47].mxu1 }
 0x197   :  { %v910_v24 = vmul.f32 %v2112_v17, %v812_v20 }
 0x198   :  { %v949_v27 = vadd.f32 %v2117_v19, %v878_v23  ;;  %v1012_v29 = vmax.f32 %v948_v21, 0.0  ;;  %v1044_v30 = vmax.f32 %v980_v22, 0.0 }
 0x199   :  { %v981_v28 = vadd.f32 %v2117_v19, %v910_v24 }
 0x19a   :  { %v1013_v31 = vmax.f32 %v949_v27, 0.0 }
 0x19b   :  { %v1045_v32 = vmax.f32 %v981_v28, 0.0  ;;  %v689_v33 = vpop.f32.mrb[48].mxu0  ;;  %v817_v34 = vpop.f32.mrb[48].mxu1 }
 0x19c   :  { %v1660_v35 = vpack.c.bf16 %v1013_v31, %v1012_v29  ;;  %v879_v37 = vmul.f32 %v2112_v17, %v689_v33  ;;  %v911_v38 = vmul.f32 %v2112_v17, %v817_v34  ;;  %v691_v39 = vpop.f32.mrb[49].mxu0  ;;  %v819_v40 = vpop.f32.mrb[49].mxu1 }
 0x19d   :  { %v1740_v36 = vpack.c.bf16 %v1045_v32, %v1044_v30  ;;  %v692_v41 = vpop.f32.mrb[50].mxu0  ;;  %v820_v42 = vpop.f32.mrb[50].mxu1 }
 0x19e   :  { %1772 = vst [vmem:[#allocation7 + $0x58] sm:$0xff] %v1660_v35   ;;  %v950_v43 = vadd.f32 %v2117_v19, %v879_v37  ;;  %v982_v44 = vadd.f32 %v2117_v19, %v911_v38  ;;  %v880_v45 = vmul.f32 %v2112_v17, %v692_v41  ;;  %v912_v46 = vmul.f32 %v2112_v17, %v820_v42  ;;  %v694_v47 = vpop.f32.mrb[51].mxu0  ;;  %v822_v48 = vpop.f32.mrb[51].mxu1 }
 0x19f   :  { %1788 = vst [vmem:[#allocation7 + $0xd8] sm:$0xff] %v1740_v36  }
 0x1a0   :  { %v951_v49 = vadd.f32 %v2117_v19, %v880_v45  ;;  %v983_v50 = vadd.f32 %v2117_v19, %v912_v46  ;;  %v1014_v51 = vmax.f32 %v950_v43, 0.0  ;;  %v1046_v52 = vmax.f32 %v982_v44, 0.0 }
 0x1a2   :  { %v1015_v53 = vmax.f32 %v951_v49, 0.0  ;;  %v1047_v54 = vmax.f32 %v983_v50, 0.0 }
 0x1a3   :  { %v697_v55 = vpop.f32.mrb[52].mxu0  ;;  %v825_v56 = vpop.f32.mrb[52].mxu1 }
 0x1a4   :  { %v1665_v57 = vpack.c.bf16 %v1015_v53, %v1014_v51  ;;  %v1745_v58 = vpack.c.bf16 %v1047_v54, %v1046_v52  ;;  %v881_v59 = vmul.f32 %v2112_v17, %v697_v55  ;;  %v913_v60 = vmul.f32 %v2112_v17, %v825_v56  ;;  %v699_v61 = vpop.f32.mrb[53].mxu0  ;;  %v827_v62 = vpop.f32.mrb[53].mxu1 }
 0x1a5   :  { %v700_v63 = vpop.f32.mrb[54].mxu0  ;;  %v828_v0 = vpop.f32.mrb[54].mxu1 }
 0x1a6   :  { %1773 = vst [vmem:[#allocation7 + $0x60] sm:$0xff] %v1665_v57   ;;  %1789 = vst [vmem:[#allocation7 + $0xe0] sm:$0xff] %v1745_v58   ;;  %v952_v1 = vadd.f32 %v2117_v19, %v881_v59  ;;  %v984_v2 = vadd.f32 %v2117_v19, %v913_v60  ;;  %v882_v3 = vmul.f32 %v2112_v17, %v700_v63  ;;  %v702_v5 = vpop.f32.mrb[55].mxu0  ;;  %v830_v6 = vpop.f32.mrb[55].mxu1 }
 0x1a7   :  { %v914_v4 = vmul.f32 %v2112_v17, %v828_v0 }
 0x1a8   :  { %v953_v7 = vadd.f32 %v2117_v19, %v882_v3  ;;  %v1016_v9 = vmax.f32 %v952_v1, 0.0  ;;  %v1048_v10 = vmax.f32 %v984_v2, 0.0 }
 0x1a9   :  { %v985_v8 = vadd.f32 %v2117_v19, %v914_v4 }
 0x1aa   :  { %v1017_v11 = vmax.f32 %v953_v7, 0.0 }
 0x1ab   :  { %v1049_v12 = vmax.f32 %v985_v8, 0.0  ;;  %v705_v13 = vpop.f32.mrb[56].mxu0  ;;  %v833_v14 = vpop.f32.mrb[56].mxu1 }
 0x1ac   :  { %v1670_v15 = vpack.c.bf16 %v1017_v11, %v1016_v9  ;;  %v883_v18 = vmul.f32 %v2112_v17, %v705_v13  ;;  %v915_v20 = vmul.f32 %v2112_v17, %v833_v14  ;;  %v707_v21 = vpop.f32.mrb[57].mxu0  ;;  %v835_v22 = vpop.f32.mrb[57].mxu1 }
 0x1ad   :  { %v1750_v16 = vpack.c.bf16 %v1049_v12, %v1048_v10  ;;  %v708_v23 = vpop.f32.mrb[58].mxu0  ;;  %v836_v24 = vpop.f32.mrb[58].mxu1 }
 0x1ae   :  { %1774 = vst [vmem:[#allocation7 + $0x68] sm:$0xff] %v1670_v15   ;;  %v954_v25 = vadd.f32 %v2117_v19, %v883_v18  ;;  %v986_v26 = vadd.f32 %v2117_v19, %v915_v20  ;;  %v884_v27 = vmul.f32 %v2112_v17, %v708_v23  ;;  %v916_v28 = vmul.f32 %v2112_v17, %v836_v24  ;;  %v710_v29 = vpop.f32.mrb[59].mxu0  ;;  %v838_v30 = vpop.f32.mrb[59].mxu1 }
 0x1af   :  { %1790 = vst [vmem:[#allocation7 + $0xe8] sm:$0xff] %v1750_v16  }
 0x1b0   :  { %v955_v31 = vadd.f32 %v2117_v19, %v884_v27  ;;  %v987_v32 = vadd.f32 %v2117_v19, %v916_v28  ;;  %v1018_v33 = vmax.f32 %v954_v25, 0.0  ;;  %v1050_v34 = vmax.f32 %v986_v26, 0.0 }
 0x1b2   :  { %v1019_v35 = vmax.f32 %v955_v31, 0.0  ;;  %v1051_v36 = vmax.f32 %v987_v32, 0.0 }
 0x1b3   :  { %v713_v37 = vpop.f32.mrb[60].mxu0  ;;  %v841_v38 = vpop.f32.mrb[60].mxu1 }
 0x1b4   :  { %v1675_v39 = vpack.c.bf16 %v1019_v35, %v1018_v33  ;;  %v1755_v40 = vpack.c.bf16 %v1051_v36, %v1050_v34  ;;  %v885_v41 = vmul.f32 %v2112_v17, %v713_v37  ;;  %v917_v42 = vmul.f32 %v2112_v17, %v841_v38  ;;  %v715_v43 = vpop.f32.mrb[61].mxu0  ;;  %v843_v44 = vpop.f32.mrb[61].mxu1 }
 0x1b5   :  { %v716_v45 = vpop.f32.mrb[62].mxu0  ;;  %v844_v46 = vpop.f32.mrb[62].mxu1 }
 0x1b6   :  { %1775 = vst [vmem:[#allocation7 + $0x70] sm:$0xff] %v1675_v39   ;;  %1791 = vst [vmem:[#allocation7 + $0xf0] sm:$0xff] %v1755_v40   ;;  %v956_v47 = vadd.f32 %v2117_v19, %v885_v41  ;;  %v988_v48 = vadd.f32 %v2117_v19, %v917_v42  ;;  %v886_v49 = vmul.f32 %v2112_v17, %v716_v45  ;;  %v718_v51 = vpop.f32.mrb[63].mxu0  ;;  %v846_v52 = vpop.f32.mrb[63].mxu1 }
 0x1b7   :  { %v918_v50 = vmul.f32 %v2112_v17, %v844_v46 }
 0x1b8   :  { %v957_v53 = vadd.f32 %v2117_v19, %v886_v49  ;;  %v1020_v55 = vmax.f32 %v956_v47, 0.0  ;;  %v1052_v56 = vmax.f32 %v988_v48, 0.0 }
 0x1b9   :  { %v989_v54 = vadd.f32 %v2117_v19, %v918_v50 }
 0x1ba   :  { %v1021_v57 = vmax.f32 %v957_v53, 0.0 }
 0x1bb   :  { %v1053_v58 = vmax.f32 %v989_v54, 0.0 }
 0x1bc   :  { %v1680_v59 = vpack.c.bf16 %v1021_v57, %v1020_v55 }
 0x1bd   :  { %v1760_v60 = vpack.c.bf16 %v1053_v58, %v1052_v56 }
 0x1be   :  { %1776 = vst [vmem:[#allocation7 + $0x78] sm:$0xff] %v1680_v59  }
 0x1bf   :  { %1792 = vst [vmem:[#allocation7 + $0xf8] sm:$0xff] %v1760_v60  }
 0x1c0   :  { %2000 = shalt.err (!%p1997_p6)
}
 0x1c1   :  { %s2001_s22 = scalar_lea.hbm %s2266_s4, 4096 }
 0x1c2   :  { %p2002_p7 = scmp.ne.s32.totalorder %s2266_s4, %s2001_s22  ;;  %p2005_p8 = scmp.lt.u32.totalorder %s2001_s22, %s2266_s4 }
 0x1c4   :  { %p2007_p9 = pnand %p2005_p8, %p2002_p7 }
 0x1c6   :  { %2010 = shalt.err (!%p2007_p9)
}
 0x1c7   :  { %1385 = dma.vmem_to_hbm [thread:$0]  %s1380_s3, 4096, %s2266_s4, [#allocation4], %s2021_s0, %s2021_s0, %s2022_s13  }
 0x1c8   :  { %2015 = dma.done.wait [#allocation4], 4096  }
 0x1c9   :  { %2016 = vsyncadd [#allocation4], 4294963200 }
 0x1ca   :  { %1389 = vsyncpa [#allocation3], 1 }
 0x1cb   :  { %1390 = vsyncpa [#allocation6], 1 }
 0x1cc   :  { %1391 = vsyncpa [#allocation4], 1 }

</bundles_post_ra>
